<compile_context>
chip_gen: v7x
topology: tpu7x:2x2x1
jax: 0.10.0
libtpu: 0.0.40
codegen_flags: <defaults>
</compile_context>

<pallas_src>
import jax
import jax.numpy as jnp
from jax.experimental import pallas as pl
from jax.experimental.pallas import tpu as pltpu


def _make_topk_segloss_kernel(hw, tm):
    """Kernel over grid (batch, core_split, pixel_tiles); last axis is the reduction."""

    def kernel(logits_ref, tgt_ref, fgw_ref, out_ref, acc_ref):
        pi = pl.program_id(2)
        n_pi = pl.num_programs(2)

        @pl.when(pi == 0)
        def _():
            acc_ref[...] = jnp.zeros_like(acc_ref)

        # Dense (tm, 128) class planes; f32 compute (bf16 inputs upcast here).
        l0 = logits_ref[0].astype(jnp.float32)
        l1 = logits_ref[1].astype(jnp.float32)
        l2 = logits_ref[2].astype(jnp.float32)
        tgt = tgt_ref[...].astype(jnp.int32)     # {-1, 0, 1, 2}; -1 = ignore_index
        fg_sel = fgw_ref[...] != 0               # int8 {0,1} foreground flag

        # 3-way elementwise log-softmax pieces (no axis-0 reductions, no iota gather).
        m = jnp.maximum(jnp.maximum(l0, l1), l2)
        lse = m + jnp.log(jnp.exp(l0 - m) + jnp.exp(l1 - m) + jnp.exp(l2 - m))
        tgt_logit = jnp.where(tgt == 0, l0, jnp.where(tgt == 1, l1, l2))
        nll = lse - tgt_logit

        # Global pixel index -> mask ragged tail rows and (clamped) duplicate tiles
        # produced by the core-split, without any tile-multiple HBM padding.
        tile = pl.program_id(1) * n_pi + pi      # logical (unclamped) tile index
        row = jax.lax.broadcasted_iota(jnp.int32, (tm, 128), 0)
        lane = jax.lax.broadcasted_iota(jnp.int32, (tm, 128), 1)
        in_range = (tile * tm + row) * 128 + lane < hw

        bg = in_range & ((tgt == 0) | (tgt == 1))
        fg = in_range & (tgt != -1) & fg_sel

        # Fully-packed VPU accumulation; jnp.where also kills NaN/Inf coming from
        # masked-out (uninitialized) tail rows.
        acc_ref[0] += jnp.where(bg, nll, 0.0)
        acc_ref[1] += jnp.where(fg, nll, 0.0)

        # Cross-tile reduce + scalar writeback once per (batch, split).
        @pl.when(pi == n_pi - 1)
        def _():
            bg_sum = jnp.sum(acc_ref[0])
            fg_sum = jnp.sum(acc_ref[1])
            r = jax.lax.broadcasted_iota(jnp.int32, out_ref.shape, 0)
            col = jax.lax.broadcasted_iota(jnp.int32, out_ref.shape, 1)
            out_ref[...] = jnp.where(
                (r == 0) & (col == 0), bg_sum,
                jnp.where((r == 0) & (col == 1), fg_sum, 0.0))

    return kernel


def topk_seg_loss(inputs, targets, unarys, topk, num_unary, *, num_classes=3,
                  tm=512, k_max=None, core_split=2):
    """Forward of TopKSegLoss (num_classes == 3 branch).

    inputs:     (b, 3, h, w) float logits (NCHW); f32 or bf16.
    targets:    (b, h, w)    signed-int labels in {-1, 0, 1, 2}; int8 recommended.
    unarys:     (b, h, w)    float unary scores (per-batch top-k -> foreground).
    topk:       (b,)         int number of foreground pixels per batch element.
    num_unary:  (b,)         int, used only in the background-loss normalizer.
    k_max:      static upper bound on max(topk); must be >= max(topk).  If None a
                full per-row sort over h*w elements is used (slow for big images).
    core_split: split the pixel reduction across this many parallel grid slots so
                both v7x TensorCores get work even when b == 1 (harmless on 1-TC
                chips).
    """
    if num_classes != 3:
        # TODO(synk): the num_classes != 3 branch of the reference module is broken
        # ("ranage" typo) and per-(i, j) topk is not implemented here.
        raise NotImplementedError("only num_classes == 3 is supported")

    b, c, h, w = inputs.shape
    assert c == 3, "num_classes == 3 requires 3-channel logits"
    hw = h * w
    n128 = (hw + 127) // 128
    hw_pad = n128 * 128

    # ---- glue: NCHW kept; (b, c, h, w) -> (b, c, hw) is a free reshape.
    logits = inputs.reshape(b, c, hw)
    if not jnp.issubdtype(targets.dtype, jnp.signedinteger):
        targets = targets.astype(jnp.int32)
    tgt = targets.reshape(b, hw)                 # narrow caller dtypes pass through

    # ---- glue: exact per-batch top-k of unary scores -> {0,1} int8 foreground mask.
    # Bounded top-k avoids a full per-row sort; the scatter touches only b * k_max
    # elements and the dense mask is 1 B/pixel.
    u = unarys.reshape(b, hw).astype(jnp.float32)
    kk = hw if k_max is None else min(int(k_max), hw)
    if k_max is not None:
        try:  # static check when topk is concrete; traced callers must guarantee it
            if int(jnp.max(topk)) > kk:
                raise ValueError("k_max must be >= max(topk): foreground set would "
                                 "be silently truncated")
        except jax.errors.ConcretizationTypeError:
            pass
    _, idx = jax.lax.top_k(u, kk)                                         # (b, kk)
    sel = (jnp.arange(kk)[None, :] < topk.astype(jnp.int32)[:, None]).astype(jnp.int8)
    fgw = jnp.zeros((b, hw), jnp.int8).at[jnp.arange(b)[:, None], idx].add(sel)

    # ---- minimal pad to the next 128 boundary (only when h*w % 128 != 0); ragged
    # pixel tiles are masked in-kernel, so no tile-multiple padding / extra HBM copy.
    pad = hw_pad - hw
    if pad:
        logits = jnp.pad(logits, ((0, 0), (0, 0), (0, pad)))
        tgt = jnp.pad(tgt, ((0, 0), (0, pad)), constant_values=-1)
        fgw = jnp.pad(fgw, ((0, 0), (0, pad)))

    # Dense (sublane, lane) pixel layout.
    logits = logits.reshape(b, c, n128, 128)
    tgt = tgt.reshape(b, n128, 128)
    fgw = fgw.reshape(b, n128, 128)

    # ---- tiling: tm rows of 128 pixels per grid step.
    tm = max(32, (int(tm) // 32) * 32)           # multiple of 32 covers f32/bf16/i8
    tm = min(tm, n128)                           # block == full dim is always legal
    n_tiles = (n128 + tm - 1) // tm
    nsplit = max(1, min(int(core_split), n_tiles))
    tps = (n_tiles + nsplit - 1) // nsplit       # tiles per split (reduction axis)

    # VMEM guard-rail: double-buffered inputs + (2, tm, 128) f32 scratch must stay
    # well under the scoped default (16 MiB v5e, 32 MiB v6e/v7x). ~2.3 MiB at tm=512.
    vmem_bytes = (2 * tm * 128 * (c * logits.dtype.itemsize
                                  + tgt.dtype.itemsize + fgw.dtype.itemsize)
                  + 2 * tm * 128 * 4 + 2 * 8 * 128 * 4)
    assert vmem_bytes < 12 * 1024 * 1024, f"tile too large for VMEM: {vmem_bytes} B"

    def _in_idx4(bi, si, pi):   # logits (b, c, n128, 128)
        return (bi, 0, jnp.minimum(si * tps + pi, n_tiles - 1), 0)

    def _in_idx3(bi, si, pi):   # targets / fg mask (b, n128, 128)
        return (bi, jnp.minimum(si * tps + pi, n_tiles - 1), 0)

    n_px = b * hw_pad
    cost = pl.CostEstimate(
        flops=24 * n_px, transcendentals=4 * n_px,
        bytes_accessed=int(n_px * (c * logits.dtype.itemsize
                                   + tgt.dtype.itemsize + fgw.dtype.itemsize)
                           + b * nsplit * 8 * 128 * 4))

    sums = pl.pallas_call(
        _make_topk_segloss_kernel(hw, tm),
        out_shape=jax.ShapeDtypeStruct((b, nsplit, 8, 128), jnp.float32),
        grid_spec=pltpu.PrefetchScalarGridSpec(
            num_scalar_prefetch=0,
            grid=(b, nsplit, tps),
            in_specs=[
                pl.BlockSpec((None, c, tm, 128), _in_idx4),    # logits
                pl.BlockSpec((None, tm, 128), _in_idx3),       # targets (narrow int)
                pl.BlockSpec((None, tm, 128), _in_idx3),       # fg mask (int8)
            ],
            out_specs=pl.BlockSpec((None, None, 8, 128),
                                   lambda bi, si, pi: (bi, si, 0, 0)),
            scratch_shapes=[pltpu.VMEM((2, tm, 128), jnp.float32)],
        ),
        compiler_params=pltpu.CompilerParams(
            dimension_semantics=("parallel", "parallel", "arbitrary")),
        cost_estimate=cost,
    )(logits, tgt, fgw)

    sum_bg = jnp.sum(sums[:, :, 0, 0])
    sum_fg = jnp.sum(sums[:, :, 0, 1])

    denom_bg = jnp.float32(b * h * w) - jnp.sum(num_unary).astype(jnp.float32) + 1.0
    denom_fg = jnp.sum(topk).astype(jnp.float32) + 1.0
    return (sum_bg / denom_bg + sum_fg / denom_fg) / 2.0


def _reference_loss(inputs, targets, unarys, topk, num_unary):
    """Pure-JAX reference matching the PyTorch module (num_classes == 3)."""
    b, c, h, w = inputs.shape
    hw = h * w
    logp = jax.nn.log_softmax(
        jnp.transpose(inputs, (0, 2, 3, 1)).reshape(b, hw, c).astype(jnp.float32), axis=-1)
    tgt = targets.reshape(b, hw).astype(jnp.int32)
    nll = -jnp.take_along_axis(logp, jnp.clip(tgt, 0, c - 1)[..., None], axis=-1)[..., 0]
    bg = (tgt == 0) | (tgt == 1)
    sum_bg = jnp.sum(jnp.where(bg, nll, 0.0))
    _, idx = jax.lax.top_k(unarys.reshape(b, hw).astype(jnp.float32), hw)
    sel = jnp.arange(hw)[None, :] < topk[:, None]
    g_nll = jnp.take_along_axis(nll, idx, axis=1)
    g_valid = jnp.take_along_axis(tgt != -1, idx, axis=1)
    sum_fg = jnp.sum(jnp.where(sel & g_valid, g_nll, 0.0))
    denom_bg = b * h * w - jnp.sum(num_unary) + 1
    denom_fg = jnp.sum(topk) + 1
    return (sum_bg / denom_bg + sum_fg / denom_fg) / 2.0


if __name__ == "__main__":
    b, c, h, w = 2, 3, 16, 16     # num_classes == 3
    key = jax.random.PRNGKey(0)
    k1, k2, k3 = jax.random.split(key, 3)

    inputs = jax.random.normal(k1, (b, c, h, w), jnp.float32)
    # int8 targets exercise the narrow-dtype HBM path ({-1, 0, 1, 2}).
    targets = jax.random.randint(k2, (b, h, w), -1, c).astype(jnp.int8)
    unarys = jax.random.uniform(k3, (b, h, w), jnp.float32)
    topk = jnp.array([5, 3], jnp.int32)
    num_unary = jnp.array([5, 3], jnp.int32)

    loss = topk_seg_loss(inputs, targets, unarys, topk, num_unary,
                         num_classes=3, k_max=8)
    jax.block_until_ready(loss)

    ref = _reference_loss(inputs, targets, unarys, topk, num_unary)
    assert jnp.allclose(loss, ref, atol=1e-4, rtol=1e-4), (float(loss), float(ref))
    print("KERNEL_OK")
</pallas_src>

<mosaic_0001>
module attributes {stable_mosaic.version = 11 : i64} {
  func.func @kernel(%arg0: i32, %arg1: i32, %arg2: i32, %arg3: memref<1x3x2x128xf32, #tpu.memory_space<vmem>>, %arg4: memref<1x2x128xi8, #tpu.memory_space<vmem>>, %arg5: memref<1x2x128xi8, #tpu.memory_space<vmem>>, %arg6: memref<1x1x8x128xf32, #tpu.memory_space<vmem>>, %arg7: memref<2x2x128xf32, #tpu.memory_space<vmem>>) attributes {dimension_semantics = [#tpu.dimension_semantics<parallel>, #tpu.dimension_semantics<parallel>, #tpu.dimension_semantics<arbitrary>], iteration_bounds = array<i64: 2, 1, 1>, scalar_prefetch = 0 : i64, scratch_operands = 1 : i64, tpu.core_type = #tpu.core_type<tc>, window_params = [{transform_indices = @transform_0, window_bounds = array<i64: 1, 3, 2, 128>}, {transform_indices = @transform_1, window_bounds = array<i64: 1, 2, 128>}, {transform_indices = @transform_2, window_bounds = array<i64: 1, 2, 128>}, {transform_indices = @transform_3, window_bounds = array<i64: 1, 1, 8, 128>}]} {
    %c0_i32 = arith.constant 0 : i32
    %0 = arith.cmpi eq, %arg2, %c0_i32 : i32
    %1 = arith.extui %0 : i1 to i32
    %c0_i32_0 = arith.constant 0 : i32
    %2 = arith.cmpi ne, %1, %c0_i32_0 : i32
    scf.if %2 {
      %cst_35 = arith.constant 0.000000e+00 : f32
      %76 = vector.broadcast %cst_35 : f32 to vector<2x2x128xf32>
      %c0_36 = arith.constant 0 : index
      %c0_37 = arith.constant 0 : index
      %c0_38 = arith.constant 0 : index
      %77 = vector.load %arg7[%c0_36, %c0_37, %c0_38] : memref<2x2x128xf32, #tpu.memory_space<vmem>>, vector<2x2x128xf32>
      tpu.vector_store %arg7[%c0_36, %c0_37, %c0_38], %76 {strides = array<i32>} : memref<2x2x128xf32, #tpu.memory_space<vmem>>, vector<2x2x128xf32>,
    } else {
    }
    %c0 = arith.constant 0 : index
    %c0_1 = arith.constant 0 : index
    %c0_2 = arith.constant 0 : index
    %c0_3 = arith.constant 0 : index
    %3 = vector.load %arg3[%c0, %c0_1, %c0_2, %c0_3] : memref<1x3x2x128xf32, #tpu.memory_space<vmem>>, vector<1x1x2x128xf32>
    %4 = vector.shape_cast %3 : vector<1x1x2x128xf32> to vector<2x128xf32>
    %c0_4 = arith.constant 0 : index
    %c1 = arith.constant 1 : index
    %c0_5 = arith.constant 0 : index
    %c0_6 = arith.constant 0 : index
    %5 = vector.load %arg3[%c0_4, %c1, %c0_5, %c0_6] : memref<1x3x2x128xf32, #tpu.memory_space<vmem>>, vector<1x1x2x128xf32>
    %6 = vector.shape_cast %5 : vector<1x1x2x128xf32> to vector<2x128xf32>
    %c0_7 = arith.constant 0 : index
    %c2 = arith.constant 2 : index
    %c0_8 = arith.constant 0 : index
    %c0_9 = arith.constant 0 : index
    %7 = vector.load %arg3[%c0_7, %c2, %c0_8, %c0_9] : memref<1x3x2x128xf32, #tpu.memory_space<vmem>>, vector<1x1x2x128xf32>
    %8 = vector.shape_cast %7 : vector<1x1x2x128xf32> to vector<2x128xf32>
    %c0_10 = arith.constant 0 : index
    %c0_11 = arith.constant 0 : index
    %c0_12 = arith.constant 0 : index
    %9 = vector.load %arg4[%c0_10, %c0_11, %c0_12] : memref<1x2x128xi8, #tpu.memory_space<vmem>>, vector<1x2x128xi8>
    %10 = vector.shape_cast %9 : vector<1x2x128xi8> to vector<2x128xi8>
    %11 = arith.extsi %10 : vector<2x128xi8> to vector<2x128xi32>
    %c0_13 = arith.constant 0 : index
    %c0_14 = arith.constant 0 : index
    %c0_15 = arith.constant 0 : index
    %12 = vector.load %arg5[%c0_13, %c0_14, %c0_15] : memref<1x2x128xi8, #tpu.memory_space<vmem>>, vector<1x2x128xi8>
    %13 = vector.shape_cast %12 : vector<1x2x128xi8> to vector<2x128xi8>
    %c0_i8 = arith.constant 0 : i8
    %14 = vector.broadcast %c0_i8 : i8 to vector<2x128xi8>
    %15 = arith.cmpi ne, %13, %14 : vector<2x128xi8>
    %16 = arith.maximumf %4, %6 : vector<2x128xf32>
    %17 = arith.maximumf %16, %8 : vector<2x128xf32>
    %18 = arith.subf %4, %17 : vector<2x128xf32>
    %19 = math.exp %18 : vector<2x128xf32>
    %20 = arith.subf %6, %17 : vector<2x128xf32>
    %21 = math.exp %20 : vector<2x128xf32>
    %22 = arith.addf %19, %21 : vector<2x128xf32>
    %23 = arith.subf %8, %17 : vector<2x128xf32>
    %24 = math.exp %23 : vector<2x128xf32>
    %25 = arith.addf %22, %24 : vector<2x128xf32>
    %26 = math.log %25 : vector<2x128xf32>
    %27 = arith.addf %17, %26 : vector<2x128xf32>
    %c0_i32_16 = arith.constant 0 : i32
    %28 = vector.broadcast %c0_i32_16 : i32 to vector<2x128xi32>
    %29 = arith.cmpi eq, %11, %28 : vector<2x128xi32>
    %c1_i32 = arith.constant 1 : i32
    %30 = vector.broadcast %c1_i32 : i32 to vector<2x128xi32>
    %31 = arith.cmpi eq, %11, %30 : vector<2x128xi32>
    %32 = arith.select %31, %6, %8 : vector<2x128xi1>, vector<2x128xf32>
    %33 = arith.select %29, %4, %32 : vector<2x128xi1>, vector<2x128xf32>
    %34 = arith.subf %27, %33 : vector<2x128xf32>
    %c1_i32_17 = arith.constant 1 : i32
    %35 = arith.muli %arg1, %c1_i32_17 : i32
    %36 = arith.addi %35, %arg2 : i32
    %37 = tpu.iota {dimensions = array<i32: 0>} : vector<2x128xi32>
    %38 = tpu.iota {dimensions = array<i32: 1>} : vector<2x128xi32>
    %c2_i32 = arith.constant 2 : i32
    %39 = arith.muli %36, %c2_i32 : i32
    %40 = vector.broadcast %39 : i32 to vector<2x128xi32>
    %41 = arith.addi %40, %37 : vector<2x128xi32>
    %c128_i32 = arith.constant 128 : i32
    %42 = vector.broadcast %c128_i32 : i32 to vector<2x128xi32>
    %43 = arith.muli %41, %42 : vector<2x128xi32>
    %44 = arith.addi %43, %38 : vector<2x128xi32>
    %c256_i32 = arith.constant 256 : i32
    %45 = vector.broadcast %c256_i32 : i32 to vector<2x128xi32>
    %46 = arith.cmpi slt, %44, %45 : vector<2x128xi32>
    %c0_i32_18 = arith.constant 0 : i32
    %47 = vector.broadcast %c0_i32_18 : i32 to vector<2x128xi32>
    %48 = arith.cmpi eq, %11, %47 : vector<2x128xi32>
    %c1_i32_19 = arith.constant 1 : i32
    %49 = vector.broadcast %c1_i32_19 : i32 to vector<2x128xi32>
    %50 = arith.cmpi eq, %11, %49 : vector<2x128xi32>
    %51 = arith.ori %48, %50 : vector<2x128xi1>
    %52 = arith.andi %46, %51 : vector<2x128xi1>
    %c-1_i32 = arith.constant -1 : i32
    %53 = vector.broadcast %c-1_i32 : i32 to vector<2x128xi32>
    %54 = arith.cmpi ne, %11, %53 : vector<2x128xi32>
    %55 = arith.andi %46, %54 : vector<2x128xi1>
    %56 = arith.andi %55, %15 : vector<2x128xi1>
    %c0_20 = arith.constant 0 : index
    %c0_21 = arith.constant 0 : index
    %c0_22 = arith.constant 0 : index
    %57 = vector.load %arg7[%c0_20, %c0_21, %c0_22] : memref<2x2x128xf32, #tpu.memory_space<vmem>>, vector<1x2x128xf32>
    %58 = vector.shape_cast %57 : vector<1x2x128xf32> to vector<2x128xf32>
    %cst = arith.constant 0.000000e+00 : f32
    %59 = vector.broadcast %cst : f32 to vector<2x128xf32>
    %60 = arith.select %52, %34, %59 : vector<2x128xi1>, vector<2x128xf32>
    %61 = arith.addf %58, %60 : vector<2x128xf32>
    %c0_23 = arith.constant 0 : index
    %c0_24 = arith.constant 0 : index
    %c0_25 = arith.constant 0 : index
    %62 = vector.load %arg7[%c0_23, %c0_24, %c0_25] : memref<2x2x128xf32, #tpu.memory_space<vmem>>, vector<1x2x128xf32>
    %63 = vector.shape_cast %62 : vector<1x2x128xf32> to vector<2x128xf32>
    %64 = vector.shape_cast %61 : vector<2x128xf32> to vector<1x2x128xf32>
    tpu.vector_store %arg7[%c0_23, %c0_24, %c0_25], %64 {strides = array<i32>} : memref<2x2x128xf32, #tpu.memory_space<vmem>>, vector<1x2x128xf32>,
    %c1_26 = arith.constant 1 : index
    %c0_27 = arith.constant 0 : index
    %c0_28 = arith.constant 0 : index
    %65 = vector.load %arg7[%c1_26, %c0_27, %c0_28] : memref<2x2x128xf32, #tpu.memory_space<vmem>>, vector<1x2x128xf32>
    %66 = vector.shape_cast %65 : vector<1x2x128xf32> to vector<2x128xf32>
    %cst_29 = arith.constant 0.000000e+00 : f32
    %67 = vector.broadcast %cst_29 : f32 to vector<2x128xf32>
    %68 = arith.select %56, %34, %67 : vector<2x128xi1>, vector<2x128xf32>
    %69 = arith.addf %66, %68 : vector<2x128xf32>
    %c1_30 = arith.constant 1 : index
    %c0_31 = arith.constant 0 : index
    %c0_32 = arith.constant 0 : index
    %70 = vector.load %arg7[%c1_30, %c0_31, %c0_32] : memref<2x2x128xf32, #tpu.memory_space<vmem>>, vector<1x2x128xf32>
    %71 = vector.shape_cast %70 : vector<1x2x128xf32> to vector<2x128xf32>
    %72 = vector.shape_cast %69 : vector<2x128xf32> to vector<1x2x128xf32>
    tpu.vector_store %arg7[%c1_30, %c0_31, %c0_32], %72 {strides = array<i32>} : memref<2x2x128xf32, #tpu.memory_space<vmem>>, vector<1x2x128xf32>,
    %c0_i32_33 = arith.constant 0 : i32
    %73 = arith.cmpi eq, %arg2, %c0_i32_33 : i32
    %74 = arith.extui %73 : i1 to i32
    %c0_i32_34 = arith.constant 0 : i32
    %75 = arith.cmpi ne, %74, %c0_i32_34 : i32
    scf.if %75 {
      %c0_35 = arith.constant 0 : index
      %c0_36 = arith.constant 0 : index
      %c0_37 = arith.constant 0 : index
      %76 = vector.load %arg7[%c0_35, %c0_36, %c0_37] : memref<2x2x128xf32, #tpu.memory_space<vmem>>, vector<1x2x128xf32>
      %77 = vector.shape_cast %76 : vector<1x2x128xf32> to vector<2x128xf32>
      %78 = vector.shape_cast %77 : vector<2x128xf32> to vector<1x2x128xf32>
      %cst_38 = arith.constant dense<0.000000e+00> : vector<1xf32>
      %79 = vector.multi_reduction <add>, %78, %cst_38 [1, 2] : vector<1x2x128xf32> to vector<1xf32>
      %80 = vector.shape_cast %79 : vector<1xf32> to vector<1x1x1xf32>
      %81 = vector.extract %80[0, 0, 0] : f32 from vector<1x1x1xf32>
      %c1_39 = arith.constant 1 : index
      %c0_40 = arith.constant 0 : index
      %c0_41 = arith.constant 0 : index
      %82 = vector.load %arg7[%c1_39, %c0_40, %c0_41] : memref<2x2x128xf32, #tpu.memory_space<vmem>>, vector<1x2x128xf32>
      %83 = vector.shape_cast %82 : vector<1x2x128xf32> to vector<2x128xf32>
      %84 = vector.shape_cast %83 : vector<2x128xf32> to vector<1x2x128xf32>
      %cst_42 = arith.constant dense<0.000000e+00> : vector<1xf32>
      %85 = vector.multi_reduction <add>, %84, %cst_42 [1, 2] : vector<1x2x128xf32> to vector<1xf32>
      %86 = vector.shape_cast %85 : vector<1xf32> to vector<1x1x1xf32>
      %87 = vector.extract %86[0, 0, 0] : f32 from vector<1x1x1xf32>
      %88 = tpu.iota {dimensions = array<i32: 0>} : vector<8x128xi32>
      %89 = tpu.iota {dimensions = array<i32: 1>} : vector<8x128xi32>
      %c0_i32_43 = arith.constant 0 : i32
      %90 = vector.broadcast %c0_i32_43 : i32 to vector<8x128xi32>
      %91 = arith.cmpi eq, %88, %90 : vector<8x128xi32>
      %c0_i32_44 = arith.constant 0 : i32
      %92 = vector.broadcast %c0_i32_44 : i32 to vector<8x128xi32>
      %93 = arith.cmpi eq, %89, %92 : vector<8x128xi32>
      %94 = arith.andi %91, %93 : vector<8x128xi1>
      %c0_i32_45 = arith.constant 0 : i32
      %95 = vector.broadcast %c0_i32_45 : i32 to vector<8x128xi32>
      %96 = arith.cmpi eq, %88, %95 : vector<8x128xi32>
      %c1_i32_46 = arith.constant 1 : i32
      %97 = vector.broadcast %c1_i32_46 : i32 to vector<8x128xi32>
      %98 = arith.cmpi eq, %89, %97 : vector<8x128xi32>
      %99 = arith.andi %96, %98 : vector<8x128xi1>
      %cst_47 = arith.constant 0.000000e+00 : f32
      %100 = vector.broadcast %87 : f32 to vector<8x128xf32>
      %101 = vector.broadcast %cst_47 : f32 to vector<8x128xf32>
      %102 = arith.select %99, %100, %101 : vector<8x128xi1>, vector<8x128xf32>
      %103 = vector.broadcast %81 : f32 to vector<8x128xf32>
      %104 = arith.select %94, %103, %102 : vector<8x128xi1>, vector<8x128xf32>
      %c0_48 = arith.constant 0 : index
      %c0_49 = arith.constant 0 : index
      %c0_50 = arith.constant 0 : index
      %c0_51 = arith.constant 0 : index
      %105 = vector.load %arg6[%c0_48, %c0_49, %c0_50, %c0_51] : memref<1x1x8x128xf32, #tpu.memory_space<vmem>>, vector<1x1x8x128xf32>
      %106 = vector.shape_cast %105 : vector<1x1x8x128xf32> to vector<8x128xf32>
      %107 = vector.shape_cast %104 : vector<8x128xf32> to vector<1x1x8x128xf32>
      tpu.vector_store %arg6[%c0_48, %c0_49, %c0_50, %c0_51], %107 {strides = array<i32>} : memref<1x1x8x128xf32, #tpu.memory_space<vmem>>, vector<1x1x8x128xf32>,
    } else {
    }
    return
  }
  func.func @transform_0(%arg0: i32, %arg1: i32, %arg2: i32) -> (i32, i32, i32, i32) {
    %c1_i32 = arith.constant 1 : i32
    %0 = arith.muli %arg1, %c1_i32 : i32
    %1 = arith.addi %0, %arg2 : i32
    %c0_i32 = arith.constant 0 : i32
    %2 = arith.minsi %1, %c0_i32 : i32
    %c0_i32_0 = arith.constant 0 : i32
    %c0_i32_1 = arith.constant 0 : i32
    %c0_i32_2 = arith.constant 0 : i32
    return %arg0, %c0_i32_0, %2, %c0_i32_1 : i32, i32, i32, i32
  }
  func.func @transform_1(%arg0: i32, %arg1: i32, %arg2: i32) -> (i32, i32, i32) {
    %c1_i32 = arith.constant 1 : i32
    %0 = arith.muli %arg1, %c1_i32 : i32
    %1 = arith.addi %0, %arg2 : i32
    %c0_i32 = arith.constant 0 : i32
    %2 = arith.minsi %1, %c0_i32 : i32
    %c0_i32_0 = arith.constant 0 : i32
    %c0_i32_1 = arith.constant 0 : i32
    return %arg0, %2, %c0_i32_0 : i32, i32, i32
  }
  func.func @transform_2(%arg0: i32, %arg1: i32, %arg2: i32) -> (i32, i32, i32) {
    %c1_i32 = arith.constant 1 : i32
    %0 = arith.muli %arg1, %c1_i32 : i32
    %1 = arith.addi %0, %arg2 : i32
    %c0_i32 = arith.constant 0 : i32
    %2 = arith.minsi %1, %c0_i32 : i32
    %c0_i32_0 = arith.constant 0 : i32
    %c0_i32_1 = arith.constant 0 : i32
    return %arg0, %2, %c0_i32_0 : i32, i32, i32
  }
  func.func @transform_3(%arg0: i32, %arg1: i32, %arg2: i32) -> (i32, i32, i32, i32) {
    %c0_i32 = arith.constant 0 : i32
    %c0_i32_0 = arith.constant 0 : i32
    %c0_i32_1 = arith.constant 0 : i32
    return %arg0, %arg1, %c0_i32, %c0_i32_0 : i32, i32, i32, i32
  }
}

</mosaic_0001>

<bundles_post_ra>
// kernel: tpu_custom_call.1
= control target key start
LH: loop header
LB: loop body
LE: loop exit
PB: predicated region body
PF: predicated region fallthrough
CT: control target
= control target key end

     0   :  { %8 = vsyncpa [#allocation4], 0  ;;  %s962_s0 = inlined_call_operand.hbm [shape: f32[2,3,2,128], index: 0, kind: input, shape index: {}]   ;;  %s963_s1 = inlined_call_operand.vmem [shape: s8[2,2,128], index: 1, kind: input, shape index: {}]   ;;  %s964_s2 = inlined_call_operand.vmem [shape: s8[2,2,128], index: 2, kind: input, shape index: {}]   ;;  %s965_s3 = inlined_call_operand.hbm [shape: f32[2,1,8,128], index: 3, kind: output, shape index: {}]  }
   0x1   :  { %10 = vsyncpa [#allocation4 + $0x1], 0 }
   0x2   :  { %11 = vsyncpa [#allocation5], 0 }
   0x3   :  { %13 = vsyncpa [#allocation5 + $0x1], 0  ;;  %s776_s12 = smov 0   ;;  %s778_s13 = smov 0  }
   0x4   :  { %s780_s14 = smov 0   ;;  %s782_s15 = smov 0  }
   0x5   :  { %s784_s16 = smov 0   ;;  %s786_s17 = smov 0  }
   0x6 LB: > { %s542_s18 = sadd.s32 4294967295, %s748_s17   ;;  %s543_s19 = sadd.s32 4294967294, %s748_s17   ;;  %s748_s17 = sphi %s786_s17, %s19_s17   ;;  %s744_s16 = sphi %s784_s16, %s980_s16   ;;  %s740_s15 = sphi %s782_s15, %s979_s15   ;;  %s736_s14 = sphi %s780_s14, %s978_s14   ;;  %s732_s13 = sphi %s778_s13, %s977_s13   ;;  %s728_s12 = sphi %s776_s12, %s976_s12  }
   0x7   : > { %s38_s20 = sadd.s32 1, %s744_s16  ;;  %s53_s21 = sadd.s32 1, %s736_s14 }
   0x8   : > { %p40_p0 = scmp.ge.s32.totalorder %s38_s20, 2  ;;  %p60_p1 = scmp.ne.s32.totalorder %s736_s14, %s732_s13 }
   0x9   : > { %p61_p2 = scmp.eq.s32.totalorder %s748_s17, 0  ;;  %p66_p3 = scmp.ne.s32.totalorder %s732_s13, %s728_s12 }
   0xa   : > { %s982_s20 = smov (%p40_p0, %s38_s20), 0  ;;  %p67_p5 = scmp.eq.s32.totalorder %s542_s18, 0 }
   0xb   : > { %p817_p4 = por %p61_p2, %p60_p1  ;;  %s48_s23 = ssub.s32 %s744_s16, %s982_s20 }
   0xc   : > { %p160_p6 = scmp.eq.s32.totalorder %s542_s18, 1  ;;  %p51_p7 = scmp.eq.s32.totalorder %s48_s23, 0 }
   0xd   : > { %p823_p8 = por %p67_p5, %p66_p3  ;;  %p166_p10 = scmp.eq.s32.totalorder %s543_s19, 1 }
   0xe   : > { %p827_p9 = por %p160_p6, %p60_p1  ;;  %p574_p13 = scmp.lt.s32.totalorder %s748_s17, 2 }
   0xf   : > { %s832_s26 = scalar_select %p51_p7, %s736_s14, %s53_s21  }
  0x10   : > { %s969_s25 = scalar_select %p827_p9, 1, 0 }
  0x11   : > { %p834_p11 = por %p166_p10, %p66_p3  ;;  %s186_s28 = sand.u32 1, %s736_s14  }
  0x12   : > { %s555_s29 = smul.u32 6, %s186_s28  ;;  %p844_p0 = pnand %p574_p13, %p817_p4 }
  0x13   : > { %s970_s27 = scalar_select %p834_p11, 1, 0 }
  0x14   : > { %s556_s30 = smul.u32 96, %s744_s16  ;;  %s190_s8 = scalar_lea.vmem [#allocation3], %s555_s29 }
  0x15   : > { %s201_s9 = sshll.u32 %s190_s8, 4  ;;  %s856_s10 = scalar_lea.sflag [#allocation4], %s186_s28  ;;  %s853_s9 = int_to_ptr.vmem [resolvable:$true] %s201_s9 }
  0x16   : > { %s851_s7 = scalar_lea.hbm %s962_s0, %s556_s30  ;;  %p638_p3 = pneg %p844_p0 }
  0x17   : > { %s636_s11 = scalar_lea.hbm %s851_s7, 96  ;;  %s641_s21 = scalar_lea.hbm %s962_s0, 192 }
  0x18   : > { %p637_p2 = scmp.ne.s32.totalorder %s851_s7, %s636_s11  ;;  %p642_p6 = scmp.lt.u32.totalorder %s851_s7, %s962_s0 }
  0x19   : > { %p643_p7 = scmp.lt.u32.totalorder %s641_s21, %s636_s11  ;;  %p645_p13 = scmp.lt.u32.totalorder %s636_s11, %s851_s7 }
  0x1a   : > { %p639_p4 = pnand %p638_p3, %p637_p2 }
  0x1b   : > { %p644_p10 = por %p643_p7, %p642_p6 }
  0x1c   : > { %p640_p5 = pneg %p639_p4 }
  0x1d   : > { %p646_p12 = por %p645_p13, %p644_p10 }
  0x1f   : > { %p647_p1 = pnand %p646_p12, %p640_p5 }
  0x21   : > { %650 = shalt.err (!%p647_p1)
}
  0x22   : > { %s651_s28 = scalar_lea.vmem %s853_s9, 96  ;;  %s750_s29 = smov [#allocation3]  }
  0x23   : > { %p652_p2 = scmp.ne.s32.totalorder %s853_s9, %s651_s28  ;;  %s656_s30 = sshll.u32 %s750_s29, 4  ;;  %s657_s30 = int_to_ptr.vmem [resolvable:$false] %s656_s30 }
  0x24   : > { %s658_s5 = scalar_lea.vmem %s657_s30, 192  ;;  %p659_p9 = scmp.lt.s32.totalorder %s853_s9, %s657_s30 }
  0x25   : > { %p654_p4 = pnand %p652_p2, %p638_p3  ;;  %p660_p6 = scmp.lt.s32.totalorder %s658_s5, %s651_s28 }
  0x27   : > { %p655_p11 = pneg %p654_p4  ;;  %p661_p7 = por %p660_p6, %p659_p9 }
  0x29   : > { %p662_p10 = pnand %p661_p7, %p655_p11 }
  0x2b   : > { %665 = shalt.err (!%p662_p10)
}
  0x2c   : > { %s751_s6 = smov 32   ;;  %s752_s8 = smov 2  }
  0x2d   : > { %569 = dma.hbm_to_vmem [thread:$0]  (!%p844_p0), %s851_s7, 96, %s853_s9, %s856_s10, %s751_s6, %s751_s6, %s752_s8  }
  0x2e   : > { %p239_p12 = scmp.lt.s32.totalorder %s748_s17, 3  ;;  %p972_p1 = scmp.ge.s32.totalorder %s748_s17, 1 }
  0x30   : > { %p240_p3 = pnand %p972_p1, %p239_p12 }
  0x31   : > { %s888_s11 = sand.u32 (!%p240_p3), 1, %s732_s13  }
  0x32   : > { %243 = sbr.rel (%p240_p3) target bundleno = 337 (0x151), region = 32  ;;  %s246_s19 = scalar_lea.sflag (!%p240_p3), [#allocation4], %s888_s11 }
  0x33   : > { %s557_s18 = smul.u32 (!%p240_p3), 6, %s888_s11 }
  0x35   : > { %s249_s21 = scalar_lea.vmem (!%p240_p3), [#allocation3], %s557_s18 }
  0x39   : > { %719 = dma.done.wait (%p823_p8), %s246_s19, 96  }
  0x3a   : > { %721 = vsyncadd (%p823_p8), %s246_s19, 4294967200  ;;  %v753_v0 = vmov 0.0   ;;  %v325_v1 = vld [vmem:[%s249_s21] sm:$0x3]  ;;  %v549_v2 = vld [vmem:[%s249_s21 + $0x2] sm:$0x3]  ;;  %v356_v13 = vlaneseq }
  0x3b   : > { %323 = vst [vmem:[#allocation2] sm:$0x3] %v753_v0  ;;  %324 = vst [vmem:[#allocation2 + $0x2] sm:$0x3] %v753_v0  ;;  %v550_v3 = vld [vmem:[%s249_s21 + $0x4] sm:$0x3]  ;;  %v334_v4 = vmax.f32 %v325_v1, %v549_v2 }
  0x3c   : > { %p296_p8 = scmp.lt.s32.totalorder %s740_s15, 1  ;;  %v904_v18 = vshrl.u32 %v356_v13, 7  ;;  %v359_v22 = vand.u32 127, %v356_v13  ;;  %v754_v24 = vmov 0   ;;  %vm387_vm10 = vcmask 1041408   ;;  %s548_s28 = sshll.u32 %s888_s11, 3 }
  0x3d   : > { %v335_v5 = vmax.f32 %v334_v4, %v550_v3  ;;  %s552_s29 = sshll.u32 %s740_s15, 7  ;;  %s289_s5 = scalar_lea.vmem [#allocation6], %s548_s28 }
  0x3e   : > { %s297_s24 = scalar_select %p296_p8, %s740_s15, 1  ;;  %v363_v23 = vmul.u32 128, %v904_v18  ;;  %vm409_vm11 = vcmp.eq.s32.totalorder %v904_v18, 0  ;;  %vm412_vm12 = vcmp.eq.s32.totalorder %v359_v22, 1  ;;  %vm410_vm13 = vcmp.eq.s32.totalorder %v359_v22, 0 }
  0x3f   : > { %v336_v6 = vsub.f32 %v325_v1, %v335_v5  ;;  %v339_v7 = vsub.f32 %v549_v2, %v335_v5  ;;  %v343_v8 = vsub.f32 %v550_v3, %v335_v5  ;;  %vm413_vm14 = vmand %vm409_vm11, %vm412_vm12  ;;  %s434_s6 = sshll.u32 %s289_s5, 4  ;;  %s913_s21 = scalar_lea.hbm %s965_s3, %s552_s29  ;;  %s915_s6 = int_to_ptr.vmem [resolvable:$true] %s434_s6 }
  0x40   : > { %s313_s9 = scalar_lea.vmem %s964_s2, %s297_s24  ;;  %s301_s23 = scalar_lea.vmem %s963_s1, %s297_s24  ;;  %v364_v26 = vadd.s32 %v363_v23, %v359_v22  ;;  %vm411_vm15 = vmand %vm409_vm11, %vm410_vm13 }
  0x41   : > { %v337_v9 = vmul.f32 1.442695, %v336_v6  ;;  %v340_v10 = vmul.f32 1.442695, %v339_v7  ;;  %v344_v11 = vmul.f32 1.442695, %v343_v8 }
  0x42   : > { %v332_v19 = vld [vmem:[%s313_s9] sm:$0x1]  ;;  %vm365_vm4 = vcmp.lt.s32.totalorder %v364_v26, 256  ;;  %v379_v35 = vld [vmem:[#allocation2 + $0x2] sm:$0x3]  ;;  %s420_s15 = scalar_lea.sflag [#allocation5], %s888_s11 }
  0x43   : > { %628 = vpow2.f32 %v337_v9  ;;  %v330_v20 = vld [vmem:[%s301_s23] sm:$0x1]  ;;  %vm333_vm0 = vnez %v332_v19  ;;  %s666_s24 = scalar_lea.vmem %s915_s6, 128  ;;  %p973_p11 = scmp.ne.s32.totalorder %s969_s25, 0 }
  0x44   : > { %630 = vpow2.f32 %v340_v10  ;;  %v331_v21 = vunpack.c.0.s8 %v330_v20  ;;  %v370_v25 = vsel %vm333_vm0, 16843009, %v754_v24  ;;  %v374_v34 = vld [vmem:[#allocation2] sm:$0x3]  ;;  %p667_p9 = scmp.ne.s32.totalorder %s915_s6, %s666_s24  ;;  %s755_s4 = smov [#allocation6]  }
  0x45   : > { %632 = vpow2.f32 %v344_v11  ;;  %v371_v27 = vunpack.c.0.s8 %v370_v25  ;;  %s670_s7 = sshll.u32 %s755_s4, 4  ;;  %s671_s7 = int_to_ptr.vmem [resolvable:$false] %s670_s7 }
  0x46   : > { %vm351_vm1 = vcmp.eq.s32.totalorder %v331_v21, 1  ;;  %vm350_vm2 = vcmp.eq.s32.totalorder %v331_v21, 0  ;;  %vm368_vm3 = vcmp.ne.s32.totalorder %v331_v21, 4294967295  ;;  %p668_p0 = pnand %p667_p9, %p973_p11  ;;  %s672_s9 = scalar_lea.vmem %s671_s7, 256 }
  0x47   : > { %v352_v28 = vsel %vm351_vm1, %v549_v2, %v550_v3  ;;  %vm366_vm5 = vmor %vm350_vm2, %vm351_vm1  ;;  %vm372_vm7 = vcmp.ne.s32.totalorder %v371_v27, 0  ;;  %p673_p13 = scmp.lt.s32.totalorder %s915_s6, %s671_s7  ;;  %p674_p2 = scmp.lt.s32.totalorder %s672_s9, %s666_s24 }
  0x48   : > { %vm369_vm6 = vmand %vm365_vm4, %vm368_vm3  ;;  %v353_v31 = vsel %vm350_vm2, %v325_v1, %v352_v28  ;;  %p669_p5 = pneg %p668_p0 }
  0x49   : > { %vm367_vm8 = vmand %vm365_vm4, %vm366_vm5  ;;  %p675_p4 = por %p674_p2, %p673_p13 }
  0x4a   : > { %vm373_vm9 = vmand %vm369_vm6, %vm372_vm7 }
  0x4b   : > { %p676_p6 = pnand %p675_p4, %p669_p5 }
  0x4d   : > { %v629_v12 = vpop.eup %628 }
  0x4e   : > { %v631_v14 = vpop.eup %630 }
  0x4f   : > { %v633_v15 = vpop.eup %632  ;;  %v342_v16 = vadd.f32 %v631_v14, %v629_v12 }
  0x51   : > { %v346_v17 = vadd.f32 %v633_v15, %v342_v16 }
  0x53   : > { %634 = vlog2.f32 %v346_v17 }
  0x5d   : > { %v635_v29 = vpop.eup %634 }
  0x5e   : > { %v348_v30 = vmul.f32 0.6931472, %v635_v29 }
  0x60   : > { %v349_v32 = vadd.f32 %v348_v30, %v335_v5 }
  0x62   : > { %v354_v33 = vsub.f32 %v349_v32, %v353_v31 }
  0x64   : > { %v375_v36 = vsel %vm367_vm8, %v354_v33, 0.0  ;;  %v380_v37 = vsel %vm373_vm9, %v354_v33, 0.0 }
  0x65   : > { %v376_v38 = vadd.f32 %v375_v36, %v374_v34  ;;  %v381_v39 = vadd.f32 %v380_v37, %v379_v35 }
  0x67   : > { %377 = vst [vmem:[#allocation2] sm:$0x3] %v376_v38  ;;  %382 = vst [vmem:[#allocation2 + $0x2] sm:$0x3] %v381_v39 }
  0x6e   : > { %v386_v40 = vld [vmem:[#allocation2] sm:$0x3]  ;;  %v398_v41 = vld [vmem:[#allocation2 + $0x2] sm:$0x3] }
  0x6f   : > { %v388_v42 = vsel %vm387_vm10, %v386_v40, 0.0  ;;  %v399_v43 = vsel %vm387_vm10, %v398_v41, 0.0 }
  0x70   : > { %389 = vadd.xlane.f32.xlu0 %v388_v42 }
  0x74   : > { %400 = vadd.xlane.f32.xlu0 %v399_v43 }
  0xfd   : > { %v390_v44 = vpop.xlane.xlu0 %389 }
  0xfe   : > { %v391_v45 = vrot.slane %v390_v44, 4 }
 0x100   : > { %v392_v46 = vadd.f32 %v391_v45, %v390_v44 }
 0x101   : > { %v401_v47 = vpop.xlane.xlu0 %400 }
 0x102   : > { %v393_v48 = vrot.slane %v392_v46, 2  ;;  %v402_v49 = vrot.slane %v401_v47, 4 }
 0x104   : > { %v403_v50 = vadd.f32 %v402_v49, %v401_v47  ;;  %v394_v51 = vadd.f32 %v393_v48, %v392_v46 }
 0x106   : > { %v404_v52 = vrot.slane %v403_v50, 2  ;;  %v395_v53 = vrot.slane %v394_v51, 1 }
 0x108   : > { %v405_v54 = vadd.f32 %v404_v52, %v403_v50  ;;  %v396_v55 = vadd.f32 %v395_v53, %v394_v51 }
 0x10a   : > { %558 = vpush %v396_v55  ;;  %v406_v56 = vrot.slane %v405_v54, 1 }
 0x10c   : > { %v407_v57 = vadd.f32 %v406_v56, %v405_v54 }
 0x10e   : > { %560 = vpush %v407_v57 }
 0x13b   : > { %s559_s30 = spop %558 }
 0x13c   : > { %v416_v59 = vstv %s559_s30 }
 0x13f   : > { %s561_s8 = spop %560 }
 0x140   : > { %v414_v58 = vstv %s561_s8 }
 0x141   : > { %v415_v60 = vsel %vm413_vm14, %v414_v58, 0.0 }
 0x142   : > { %v417_v61 = vsel %vm411_vm15, %v416_v59, %v415_v60 }
 0x143   : > { %418 = vst [vmem:[%s289_s5] sm:$0xff] %v417_v61 }
 0x144   : > { %679 = shalt.err (!%p676_p6)
}
 0x145   : > { %s680_s11 = scalar_lea.hbm %s913_s21, 128  ;;  %s684_s23 = scalar_lea.hbm %s965_s3, 256 }
 0x146   : > { %p681_p7 = scmp.ne.s32.totalorder %s913_s21, %s680_s11  ;;  %p685_p1 = scmp.lt.u32.totalorder %s913_s21, %s965_s3 }
 0x147   : > { %p686_p3 = scmp.lt.u32.totalorder %s684_s23, %s680_s11  ;;  %p688_p9 = scmp.lt.u32.totalorder %s680_s11, %s913_s21 }
 0x148   : > { %p682_p10 = pnand %p681_p7, %p973_p11 }
 0x149   : > { %p687_p8 = por %p686_p3, %p685_p1 }
 0x14a   : > { %p683_p12 = pneg %p682_p10 }
 0x14b   : > { %p689_p0 = por %p688_p9, %p687_p8 }
 0x14d   : > { %p690_p5 = pnand %p689_p0, %p683_p12 }
 0x14f   : > { %693 = shalt.err (!%p690_p5)
}
 0x150   : > { %564 = dma.vmem_to_hbm [thread:$0]  (%p973_p11), %s915_s6, 128, %s913_s21, %s420_s15  }
 0x151 PF: > { %s446_s30 = sand.u32 1, %s728_s12   ;;  %p974_p13 = scmp.ne.s32.totalorder %s970_s27, 0 }
 0x152   : > { %p975_p2 = scmp.ge.s32.totalorder %s748_s17, 2  ;;  %s447_s5 = scalar_lea.sflag [#allocation5], %s446_s30 }
 0x154   : > { %p571_p4 = pnand %p975_p2, %p974_p13 }
 0x156   : > { %723 = dma.done.wait (!%p571_p4), %s447_s5, 128  }
 0x157   : > { %725 = vsyncadd (!%p571_p4), %s447_s5, 4294967168  ;;  %s19_s17 = sadd.s32 1, %s748_s17   ;;  %s976_s12 = smov %s732_s13 }
 0x158   : > { %p16_p6 = scmp.ge.s32.totalorder %s19_s17, 4   ;;  %s977_s13 = smov %s736_s14 }
 0x159   : > { %s978_s14 = smov %s832_s26  ;;  %s979_s15 = smov %s744_s16 }
 0x15a   : > { %s980_s16 = smov %s982_s20  ;;  %18 = sbr.rel (!%p16_p6) target bundleno = 6 (0x6), region = 94 }
 0x161   :  { %452 = vsyncpa [#allocation4], 1 }
 0x162   :  { %454 = vsyncpa [#allocation4 + $0x1], 1 }
 0x163   :  { %455 = vsyncpa [#allocation5], 1 }
 0x164   :  { %457 = vsyncpa [#allocation5 + $0x1], 1 }

</bundles_post_ra>
